<compile_context>
chip_gen: v6e
topology: v6e:2x2x1
jax: 0.10.0
libtpu: 0.0.40
codegen_flags: <defaults>
</compile_context>

<pallas_src>
import jax
import jax.numpy as jnp
from jax.experimental import pallas as pl
from jax.experimental.pallas import tpu as pltpu


def social_agg_kernel(x_ref, w1_ref, b1_ref, w2_ref, b2_ref, out_ref):
    # x_ref: (TM, Dp) batch of gathered member embeddings (lane-dense, Dp % 128 == 0)
    x = x_ref[...]
    h = jnp.dot(x, w1_ref[...], preferred_element_type=jnp.float32) + b1_ref[...]
    h = jnp.maximum(h, 0.0)                                            # ReLU (f32)
    y = jnp.dot(h.astype(w2_ref.dtype), w2_ref[...],
                preferred_element_type=jnp.float32) + b2_ref[...]
    out_ref[...] = y.astype(out_ref.dtype)


def _round_up(x, m):
    return ((x + m - 1) // m) * m


def _xla_forward(gathered, w1, b1, w2, b2, compute_dtype, out_dtype):
    """Plain-XLA path for tiny problems (launch overhead would dominate)."""
    x = gathered.astype(compute_dtype)
    h = jnp.dot(x, w1.astype(compute_dtype),
                preferred_element_type=jnp.float32) + b1.astype(jnp.float32)
    h = jnp.maximum(h, 0.0)
    y = jnp.dot(h.astype(compute_dtype), w2.astype(compute_dtype),
                preferred_element_type=jnp.float32) + b2.astype(jnp.float32)
    return y.astype(out_dtype)


def social_aggregator_forward(nodes, to_neighs, u2e_weight, w1, b1, w2, b2,
                              *, block_rows=256,
                              compute_dtype=jnp.bfloat16,
                              out_dtype=jnp.float32,
                              return_padded=False):
    """Pallas implementation of Social_Aggregator.forward.

    `to_neighs` is accepted only for API parity with the PyTorch module; the
    reference forward reads len(to_neighs[i]) but never uses it in the output.
    """
    del to_neighs  # unused by the reference output
    nodes = jnp.asarray(nodes, dtype=jnp.int32)
    n = nodes.shape[0]
    d = u2e_weight.shape[1]

    # Tiny-input fast path: kernel launch + 128-lane padding overhead dominates.
    if n <= 64 or d <= 32:
        gathered = jnp.take(u2e_weight, nodes, axis=0)
        return _xla_forward(gathered, w1, b1, w2, b2, compute_dtype, out_dtype)

    # Lane-dense feature dim; row tile a multiple of 8 sublanes, capped so the
    # grid has >= 2 steps (lets ("parallel",) shard rows across the v7x TCs).
    d_pad = _round_up(d, 128)
    tm = max(8, min(block_rows, _round_up(pl.cdiv(n, 2), 8)))
    n_pad = _round_up(n, tm)
    grid = (n_pad // tm,)

    # Pad/cast the table & params once (constant under jit) and pad the node ids
    # with a valid index: the single jnp.take then yields the (n_pad, Dp)
    # lane-dense activation slab directly -- no extra pad pass over activations.
    # Zero row/col padding with zero-padded biases is mathematically inert; the
    # extra gathered rows (index 0) are discarded by the final row slice.
    u2e_p = jnp.pad(u2e_weight.astype(compute_dtype), ((0, 0), (0, d_pad - d)))
    nodes_p = jnp.pad(nodes, (0, n_pad - n))
    x_p = jnp.take(u2e_p, nodes_p, axis=0)                       # (n_pad, d_pad)

    def pad2(a, rows, cols, dt):
        a = a.astype(dt)
        return jnp.pad(a, ((0, rows - a.shape[0]), (0, cols - a.shape[1])))

    w1_p = pad2(w1, d_pad, d_pad, compute_dtype)
    w2_p = pad2(w2, d_pad, d_pad, compute_dtype)
    b1_p = pad2(b1, 1, d_pad, jnp.float32)      # biases stay f32 (added to f32 acc)
    b2_p = pad2(b2, 1, d_pad, jnp.float32)

    # Real VMEM footprint (+50% headroom), never the full physical VMEM.
    cb = jnp.dtype(compute_dtype).itemsize
    ob = jnp.dtype(out_dtype).itemsize
    vmem_need = (2 * tm * d_pad * cb                       # x tile, double-buffered
                 + 2 * tm * d_pad * ob                     # out tile, double-buffered
                 + (2 * d_pad * d_pad * cb + 2 * d_pad * 4)  # weights/biases, single-buffered
                 + 2 * tm * d_pad * 4)                     # f32 intermediates
    vmem_limit = int(min(max(vmem_need * 3 // 2, 4 << 20), 48 << 20))

    out = pl.pallas_call(
        social_agg_kernel,
        grid_spec=pl.GridSpec(
            grid=grid,
            in_specs=[
                # Batched activations: one (TM, Dp) tile per grid step.
                pl.BlockSpec((tm, d_pad), lambda i: (i, 0)),
                # MLP parameters: resident every step -> single-buffer them.
                pl.BlockSpec((d_pad, d_pad), lambda i: (0, 0),
                             pipeline_mode=pl.Buffered(1)),
                pl.BlockSpec((1, d_pad), lambda i: (0, 0),
                             pipeline_mode=pl.Buffered(1)),
                pl.BlockSpec((d_pad, d_pad), lambda i: (0, 0),
                             pipeline_mode=pl.Buffered(1)),
                pl.BlockSpec((1, d_pad), lambda i: (0, 0),
                             pipeline_mode=pl.Buffered(1)),
            ],
            out_specs=pl.BlockSpec((tm, d_pad), lambda i: (i, 0)),
        ),
        out_shape=jax.ShapeDtypeStruct((n_pad, d_pad), out_dtype),
        compiler_params=pltpu.CompilerParams(
            dimension_semantics=("parallel",),   # shard rows across TCs on v7x
            vmem_limit_bytes=vmem_limit,
        ),
    )(x_p, w1_p, b1_p, w2_p, b2_p)

    if return_padded:
        return out
    if n_pad == n and d_pad == d:
        return out
    if d_pad == d:
        return out[:n]          # cheap row-only slice when D is already lane-dense
    return out[:n, :d]


if __name__ == "__main__":
    key = jax.random.PRNGKey(0)
    k1, k2, k3, k4, k5, k6, k7, k8 = jax.random.split(key, 8)

    # ---------------------------------------------------------------
    # Test 1: module-spec-sized tiny case (N=8, D=32) -> XLA fast path.
    # ---------------------------------------------------------------
    num_users_s, d_s, n_s = 64, 32, 8
    u2e_s = jax.random.normal(k1, (num_users_s, d_s), dtype=jnp.float32)
    w1_s = jax.random.normal(k2, (d_s, d_s), dtype=jnp.float32) * 0.1
    b1_s = jax.random.normal(k3, (1, d_s), dtype=jnp.float32) * 0.1
    w2_s = jax.random.normal(k4, (d_s, d_s), dtype=jnp.float32) * 0.1
    b2_s = jax.random.normal(k5, (1, d_s), dtype=jnp.float32) * 0.1
    nodes_s = jax.random.randint(k6, (n_s,), 0, num_users_s, dtype=jnp.int32)
    to_neighs_s = [list(range((int(x) % 5) + 1)) for x in nodes_s]

    out_s = social_aggregator_forward(nodes_s, to_neighs_s, u2e_s, w1_s, b1_s,
                                      w2_s, b2_s, compute_dtype=jnp.float32)
    out_s = jax.block_until_ready(out_s)
    ref_s = jnp.maximum(u2e_s[nodes_s] @ w1_s + b1_s, 0.0) @ w2_s + b2_s
    assert out_s.shape == (n_s, d_s)
    assert jnp.allclose(out_s, ref_s, atol=1e-5, rtol=1e-5)

    # ---------------------------------------------------------------
    # Test 2: Pallas path, f32 compute (exact check against plain JAX).
    # ---------------------------------------------------------------
    num_users, d, n = 512, 128, 200
    u2e_w = jax.random.normal(k1, (num_users, d), dtype=jnp.float32)
    w1 = jax.random.normal(k2, (d, d), dtype=jnp.float32) * 0.1
    b1 = jax.random.normal(k3, (1, d), dtype=jnp.float32) * 0.1
    w2 = jax.random.normal(k4, (d, d), dtype=jnp.float32) * 0.1
    b2 = jax.random.normal(k5, (1, d), dtype=jnp.float32) * 0.1
    nodes = jax.random.randint(k7, (n,), 0, num_users, dtype=jnp.int32)
    to_neighs = [list(range((int(x) % 5) + 1)) for x in nodes]

    ref = jnp.maximum(u2e_w[nodes] @ w1 + b1, 0.0) @ w2 + b2   # (N, D) f32

    out_f32 = social_aggregator_forward(nodes, to_neighs, u2e_w, w1, b1, w2, b2,
                                        compute_dtype=jnp.float32)
    out_f32 = jax.block_until_ready(out_f32)
    assert out_f32.shape == (n, d)
    assert jnp.allclose(out_f32, ref, atol=1e-4, rtol=1e-4)

    # ---------------------------------------------------------------
    # Test 3: Pallas path, bf16 compute (default; bandwidth-optimal).
    # ---------------------------------------------------------------
    out_bf16 = social_aggregator_forward(nodes, to_neighs, u2e_w, w1, b1, w2, b2)
    out_bf16 = jax.block_until_ready(out_bf16)
    assert out_bf16.shape == (n, d)
    assert jnp.allclose(out_bf16, ref, atol=5e-2, rtol=5e-2)

    print("KERNEL_OK")
</pallas_src>

<mosaic_0001>
module attributes {stable_mosaic.version = 11 : i64} {
  func.func @social_agg_kernel(%arg0: i32, %arg1: memref<104x128xf32, #tpu.memory_space<vmem>>, %arg2: memref<128x128xf32, #tpu.memory_space<vmem>>, %arg3: memref<1x128xf32, #tpu.memory_space<vmem>>, %arg4: memref<128x128xf32, #tpu.memory_space<vmem>>, %arg5: memref<1x128xf32, #tpu.memory_space<vmem>>, %arg6: memref<104x128xf32, #tpu.memory_space<vmem>>) attributes {dimension_semantics = [#tpu.dimension_semantics<parallel>], iteration_bounds = array<i64: 2>, scalar_prefetch = 0 : i64, scratch_operands = 0 : i64, tpu.core_type = #tpu.core_type<tc>, window_params = [{transform_indices = @transform_0, window_bounds = array<i64: 104, 128>}, {pipeline_mode = #tpu.pipeline_mode<synchronous>, transform_indices = @transform_1, window_bounds = array<i64: 128, 128>}, {pipeline_mode = #tpu.pipeline_mode<synchronous>, transform_indices = @transform_2, window_bounds = array<i64: 1, 128>}, {pipeline_mode = #tpu.pipeline_mode<synchronous>, transform_indices = @transform_3, window_bounds = array<i64: 128, 128>}, {pipeline_mode = #tpu.pipeline_mode<synchronous>, transform_indices = @transform_4, window_bounds = array<i64: 1, 128>}, {transform_indices = @transform_5, window_bounds = array<i64: 104, 128>}]} {
    %c0 = arith.constant 0 : index
    %c0_0 = arith.constant 0 : index
    %0 = vector.load %arg1[%c0, %c0_0] : memref<104x128xf32, #tpu.memory_space<vmem>>, vector<104x128xf32>
    %c0_1 = arith.constant 0 : index
    %c0_2 = arith.constant 0 : index
    %1 = vector.load %arg2[%c0_1, %c0_2] : memref<128x128xf32, #tpu.memory_space<vmem>>, vector<128x128xf32>
    %cst = arith.constant dense<0.000000e+00> : vector<104x128xf32>
    %2 = tpu.matmul %0, %1, %cst {dimension_numbers = #tpu.dot_dimension_numbers<[1], [0], [0], [1], [0, 0, 1, 1], [], []>} : vector<104x128xf32>, vector<128x128xf32>, vector<104x128xf32> -> vector<104x128xf32>
    %c0_3 = arith.constant 0 : index
    %c0_4 = arith.constant 0 : index
    %3 = vector.load %arg3[%c0_3, %c0_4] : memref<1x128xf32, #tpu.memory_space<vmem>>, vector<1x128xf32>
    %4 = vector.broadcast %3 : vector<1x128xf32> to vector<104x128xf32>
    %5 = arith.addf %2, %4 : vector<104x128xf32>
    %cst_5 = arith.constant 0.000000e+00 : f32
    %6 = vector.broadcast %cst_5 : f32 to vector<104x128xf32>
    %7 = arith.maximumf %5, %6 : vector<104x128xf32>
    %c0_6 = arith.constant 0 : index
    %c0_7 = arith.constant 0 : index
    %8 = vector.load %arg4[%c0_6, %c0_7] : memref<128x128xf32, #tpu.memory_space<vmem>>, vector<128x128xf32>
    %cst_8 = arith.constant dense<0.000000e+00> : vector<104x128xf32>
    %9 = tpu.matmul %7, %8, %cst_8 {dimension_numbers = #tpu.dot_dimension_numbers<[1], [0], [0], [1], [0, 0, 1, 1], [], []>} : vector<104x128xf32>, vector<128x128xf32>, vector<104x128xf32> -> vector<104x128xf32>
    %c0_9 = arith.constant 0 : index
    %c0_10 = arith.constant 0 : index
    %10 = vector.load %arg5[%c0_9, %c0_10] : memref<1x128xf32, #tpu.memory_space<vmem>>, vector<1x128xf32>
    %11 = vector.broadcast %10 : vector<1x128xf32> to vector<104x128xf32>
    %12 = arith.addf %9, %11 : vector<104x128xf32>
    %c0_11 = arith.constant 0 : index
    %c0_12 = arith.constant 0 : index
    %13 = vector.load %arg6[%c0_11, %c0_12] : memref<104x128xf32, #tpu.memory_space<vmem>>, vector<104x128xf32>
    tpu.vector_store %arg6[%c0_11, %c0_12], %12 {strides = array<i32>} : memref<104x128xf32, #tpu.memory_space<vmem>>, vector<104x128xf32>,
    return
  }
  func.func @transform_0(%arg0: i32) -> (i32, i32) {
    %c0_i32 = arith.constant 0 : i32
    %c0_i32_0 = arith.constant 0 : i32
    return %arg0, %c0_i32 : i32, i32
  }
  func.func @transform_1(%arg0: i32) -> (i32, i32) {
    %c0_i32 = arith.constant 0 : i32
    %c0_i32_0 = arith.constant 0 : i32
    %c0_i32_1 = arith.constant 0 : i32
    return %c0_i32, %c0_i32_0 : i32, i32
  }
  func.func @transform_2(%arg0: i32) -> (i32, i32) {
    %c0_i32 = arith.constant 0 : i32
    %c0_i32_0 = arith.constant 0 : i32
    %c0_i32_1 = arith.constant 0 : i32
    return %c0_i32, %c0_i32_0 : i32, i32
  }
  func.func @transform_3(%arg0: i32) -> (i32, i32) {
    %c0_i32 = arith.constant 0 : i32
    %c0_i32_0 = arith.constant 0 : i32
    %c0_i32_1 = arith.constant 0 : i32
    return %c0_i32, %c0_i32_0 : i32, i32
  }
  func.func @transform_4(%arg0: i32) -> (i32, i32) {
    %c0_i32 = arith.constant 0 : i32
    %c0_i32_0 = arith.constant 0 : i32
    %c0_i32_1 = arith.constant 0 : i32
    return %c0_i32, %c0_i32_0 : i32, i32
  }
  func.func @transform_5(%arg0: i32) -> (i32, i32) {
    %c0_i32 = arith.constant 0 : i32
    %c0_i32_0 = arith.constant 0 : i32
    return %arg0, %c0_i32 : i32, i32
  }
}

</mosaic_0001>

<bundles_post_ra>
// kernel: tpu_custom_call.1
= control target key start
LH: loop header
LB: loop body
LE: loop exit
PB: predicated region body
PF: predicated region fallthrough
CT: control target
= control target key end

     0   :  { %10 = vsyncpa [#allocation3], 0  ;;  %s1543_s0 = inlined_call_operand.hbm [shape: f32[208,128], index: 0, kind: input, shape index: {}]   ;;  %s1544_s1 = inlined_call_operand.hbm [shape: f32[128,128], index: 1, kind: input, shape index: {}]   ;;  %s1545_s2 = inlined_call_operand.vmem [shape: f32[1,128], index: 2, kind: input, shape index: {}]   ;;  %s1546_s3 = inlined_call_operand.hbm [shape: f32[128,128], index: 3, kind: input, shape index: {}]   ;;  %s1547_s4 = inlined_call_operand.vmem [shape: f32[1,128], index: 4, kind: input, shape index: {}]   ;;  %s1548_s5 = inlined_call_operand.hbm [shape: f32[208,128], index: 5, kind: output, shape index: {}]  }
   0x1   :  { %12 = vsyncpa [#allocation3 + $0x1], 0 }
   0x2   :  { %13 = vsyncpa [#allocation6], 0 }
   0x3   :  { %14 = vsyncpa [#allocation4], 0 }
   0x4   :  { %16 = vsyncpa [#allocation4 + $0x1], 0  ;;  %s1206_s18 = smov 0   ;;  %s1208_s19 = smov 0  }
   0x5   :  { %s1210_s20 = smov 0   ;;  %s1212_s21 = smov 0  }
   0x6 LB: > { %s1227_s22 = sadd.s32 4294967295, %s1164_s21   ;;  %s725_s23 = sadd.s32 4294967294, %s1164_s21   ;;  %s1164_s21 = sphi %s1212_s21, %s1571_s21   ;;  %s1160_s20 = sphi %s1210_s20, %s1570_s20   ;;  %s1156_s19 = sphi %s1208_s19, %s1569_s19   ;;  %s1152_s18 = sphi %s1206_s18, %s1568_s18  }
   0x7   : > { %p42_p0 = scmp.ne.s32.totalorder %s1156_s19, %s1152_s18  ;;  %p1550_p1 = scmp.eq.s32.totalorder %s1227_s22, 0 }
   0x8   : > { %p150_p2 = scmp.eq.s32.totalorder %s1227_s22, 1  ;;  %p156_p3 = scmp.eq.s32.totalorder %s725_s23, 1 }
   0x9   : > { %p1236_p4 = por %p1550_p1, %p42_p0  ;;  %p726_p5 = scmp.ge.s32.totalorder %s1164_s21, 1 }
   0xa   : > { %p1241_p6 = por %p156_p3, %p42_p0  ;;  %p163_p7 = scmp.lt.s32.totalorder %s1164_s21, 3 }
   0xb   : > { %s1554_s24 = scalar_select %p1236_p4, 1, 0 }
   0xc   : > { %s1555_s25 = scalar_select %p1241_p6, 1, 0 }
   0xd   : > { %p1246_p8 = pnand %p726_p5, %p163_p7  ;;  %s1166_s27 = smov [#allocation5]  }
   0xe   : > { %s175_s28 = sshll.u32 %s1166_s27, 4  ;;  %s1167_s30 = smov [#allocation7]   ;;  %s176_s28 = int_to_ptr.vmem [resolvable:$true] %s175_s28 }
   0xf   : > { %s1556_s26 = scalar_select %p1246_p8, 1, 0 }
  0x10   : > { %p955_p9 = pneg %p1246_p8  ;;  %s191_s6 = sshll.u32 %s1167_s30, 4  ;;  %s192_s6 = int_to_ptr.vmem [resolvable:$true] %s191_s6 }
  0x11   : > { %s1027_s7 = scalar_lea.vmem %s176_s28, 2048  ;;  %p1035_p5 = scmp.lt.s32.totalorder %s176_s28, %s176_s28 }
  0x12   : > { %p1255_p11 = pnand %p955_p9, %p1550_p1  ;;  %p1028_p13 = scmp.ne.s32.totalorder %s176_s28, %s1027_s7 }
  0x13   : > { %p1036_p7 = scmp.lt.s32.totalorder %s1027_s7, %s1027_s7 }
  0x14   : > { %p1018_p12 = pneg %p1255_p11 }
  0x15   : > { %p1037_p10 = por %p1036_p7, %p1035_p5 }
  0x16   : > { %p1030_p0 = pnand %p1028_p13, %p1018_p12 }
  0x18   : > { %p1031_p3 = pneg %p1030_p0 }
  0x1a   : > { %p1038_p9 = pnand %p1037_p10, %p1031_p3 }
  0x1c   : > { %1041 = shalt.err (!%p1038_p9)
}
  0x1d   : > { %s1549_s8 = smov 128   ;;  %s1169_s9 = smov 8  }
  0x1e   : > { %958 = dma.hbm_to_vmem [thread:$0]  (!%p1255_p11), %s1544_s1, 2048, %s176_s28, [#allocation6], %s1549_s8, %s1549_s8, %s1169_s9  }
  0x1f   : > { %s1053_s12 = scalar_lea.vmem %s192_s6, 2048  ;;  %p1061_p10 = scmp.lt.s32.totalorder %s192_s6, %s192_s6 }
  0x20   : > { %p1054_p13 = scmp.ne.s32.totalorder %s192_s6, %s1053_s12  ;;  %p1062_p3 = scmp.lt.s32.totalorder %s1053_s12, %s1053_s12 }
  0x22   : > { %p1056_p0 = pnand %p1054_p13, %p1018_p12  ;;  %p1063_p7 = por %p1062_p3, %p1061_p10 }
  0x24   : > { %p1057_p5 = pneg %p1056_p0 }
  0x26   : > { %p1064_p9 = pnand %p1063_p7, %p1057_p5 }
  0x28   : > { %1067 = shalt.err (!%p1064_p9)
}
  0x29   : > { %961 = dma.hbm_to_vmem [thread:$0]  (!%p1255_p11), %s1546_s3, 2048, %s192_s6, [#allocation6], %s1549_s8, %s1549_s8, %s1169_s9  }
  0x2a   : > { %s1284_s15 = sadd.s32 1, %s1164_s21   ;;  %s29_s16 = sadd.s32 1, %s1160_s20 }
  0x2b   : > { %s26_s17 = ssub.s32 %s1164_s21, %s1284_s15  ;;  %p36_p12 = scmp.ne.s32.totalorder %s1160_s20, %s1156_s19 }
  0x2c   : > { %p27_p13 = scmp.eq.s32.totalorder %s26_s17, 0  ;;  %p37_p0 = scmp.eq.s32.totalorder %s1164_s21, 0 }
  0x2d   : > { %p1294_p5 = por %p150_p2, %p36_p12  ;;  %p972_p10 = scmp.lt.s32.totalorder %s1164_s21, 2 }
  0x2e   : > { %s1300_s27 = scalar_select %p27_p13, %s1160_s20, %s29_s16  }
  0x2f   : > { %s1558_s23 = scalar_select %p1294_p5, 1, 0 }
  0x30   : > { %p38_p3 = por %p37_p0, %p36_p12  ;;  %s208_s28 = sand.u32 1, %s1160_s20  }
  0x31   : > { %s941_s29 = smul.u32 104, %s208_s28  ;;  %s1315_s14 = scalar_lea.sflag [#allocation3], %s208_s28 }
  0x32   : > { %s739_s30 = smul.u32 1664, %s1164_s21  ;;  %p1304_p11 = pnand %p972_p10, %p38_p3 }
  0x33   : > { %s212_s12 = scalar_lea.vmem [#allocation2], %s941_s29 }
  0x34   : > { %s1311_s11 = scalar_lea.hbm %s1543_s0, %s739_s30  ;;  %s219_s13 = sshll.u32 %s212_s12, 4  ;;  %s1313_s13 = int_to_ptr.vmem [resolvable:$true] %s219_s13 }
  0x35   : > { %s1068_s16 = scalar_lea.hbm %s1311_s11, 1664  ;;  %p1070_p7 = pneg %p1304_p11 }
  0x36   : > { %p1069_p2 = scmp.ne.s32.totalorder %s1311_s11, %s1068_s16  ;;  %s1073_s30 = scalar_lea.hbm %s1543_s0, 3328 }
  0x37   : > { %p1074_p13 = scmp.lt.s32.totalorder %s1311_s11, %s1543_s0  ;;  %p1075_p0 = scmp.lt.s32.totalorder %s1073_s30, %s1068_s16 }
  0x38   : > { %p1071_p9 = pnand %p1070_p7, %p1069_p2 }
  0x39   : > { %p1076_p10 = por %p1075_p0, %p1074_p13 }
  0x3a   : > { %p1072_p12 = pneg %p1071_p9 }
  0x3c   : > { %p1077_p3 = pnand %p1076_p10, %p1072_p12 }
  0x3e   : > { %1080 = shalt.err (!%p1077_p3)
}
  0x3f   : > { %s1081_s28 = scalar_lea.vmem %s1313_s13, 1664  ;;  %s1170_s29 = smov [#allocation2]  }
  0x40   : > { %p1082_p1 = scmp.ne.s32.totalorder %s1313_s13, %s1081_s28  ;;  %s1086_s12 = sshll.u32 %s1170_s29, 4  ;;  %s1087_s12 = int_to_ptr.vmem [resolvable:$false] %s1086_s12 }
  0x41   : > { %s1088_s17 = scalar_lea.vmem %s1087_s12, 3328  ;;  %p1089_p9 = scmp.lt.s32.totalorder %s1313_s13, %s1087_s12 }
  0x42   : > { %p1084_p6 = pnand %p1082_p1, %p1070_p7  ;;  %p1090_p5 = scmp.lt.s32.totalorder %s1088_s17, %s1081_s28 }
  0x44   : > { %p1085_p2 = pneg %p1084_p6  ;;  %p1091_p4 = por %p1090_p5, %p1089_p9 }
  0x46   : > { %p1092_p8 = pnand %p1091_p4, %p1085_p2 }
  0x48   : > { %1095 = shalt.err (!%p1092_p8)
}
  0x49   : > { %s1560_s8 = smov 128   ;;  %p1561_p1 = scmp.ne.s32.totalorder %s1556_s26, 0 }
  0x4a   : > { %965 = dma.hbm_to_vmem [thread:$0]  (!%p1304_p11), %s1311_s11, 1664, %s1313_s13, %s1315_s14, %s1560_s8, %s1560_s8, %s1169_s9  }
  0x4b   : > { %231 = sbr.rel (%p1561_p1) target bundleno = 572 (0x23c), region = 40  ;;  %s1342_s16 = sand.u32 (!%p1561_p1), 1, %s1156_s19  }
  0x4c   : > { %s942_s7 = smul.u32 (!%p1561_p1), 104, %s1342_s16  ;;  %s234_s30 = scalar_lea.sflag (!%p1561_p1), [#allocation3], %s1342_s16 }
  0x4d   : > { %p1562_p4 = scmp.ne.s32.totalorder (!%p1561_p1), %s1554_s24, 0 }
  0x4e   : > { %s1348_s6 = scalar_lea.vmem (!%p1561_p1), [#allocation2], %s942_s7 }
  0x50   : > { %1139 = dma.done.wait (%p1562_p4), %s234_s30, 1664  }
  0x51   : > { %1141 = vsyncadd (%p1562_p4), %s234_s30, 4294965632  ;;  %p1563_p6 = scmp.eq.s32.totalorder %s1227_s22, 0 }
  0x53   : > { %1143 = dma.done.wait (%p1563_p6), [#allocation6], 4096   ;;  %p1564_p8 = pmov %p1563_p6 }
  0x54   : > { %v1171_v0 = vmov 0.0   ;;  %vm1172_vm0 = vmmov 0   ;;  %v302_v1 = vld [vmem:[#allocation5 + $0x78] sm:$0xff]  ;;  %v301_v2 = vld [vmem:[#allocation5 + $0x70] sm:$0xff]  ;;  %v300_v3 = vld [vmem:[#allocation5 + $0x68] sm:$0xff]  ;;  %s1478_s13 = scalar_lea.vmem [#allocation8], %s942_s7 }
  0x55   : > { %1145 = vsyncadd (%p1564_p8), [#allocation6], 4294963200  ;;  %799 = vmatprep.subr.mxu0 %v1171_v0  ;;  %831 = vmatprep.mubr.msk.f32.mxu0 %vm1172_vm0, %v1171_v0  ;;  %v299_v4 = vld [vmem:[#allocation5 + $0x60] sm:$0xff]  ;;  %v298_v5 = vld [vmem:[#allocation5 + $0x58] sm:$0xff]  ;;  %s740_s14 = smul.u32 1664, %s1227_s22  ;;  %s633_s10 = sshll.u32 %s1478_s13, 4  ;;  %s1499_s10 = int_to_ptr.vmem [resolvable:$true] %s633_s10 }
  0x56   : > { %870 = vmatprep.subr.mxu1 %v1171_v0  ;;  %902 = vmatprep.mubr.msk.f32.mxu1 %vm1172_vm0, %v1171_v0  ;;  %v297_v6 = vld [vmem:[#allocation5 + $0x50] sm:$0xff]  ;;  %v468_v7 = vld [vmem:[#allocation7 + $0x78] sm:$0xff]  ;;  %v296_v8 = vld [vmem:[#allocation5 + $0x48] sm:$0xff]  ;;  %s620_s17 = scalar_lea.sflag [#allocation4], %s1342_s16  ;;  %s1096_s22 = scalar_lea.vmem %s1499_s10, 1664 }
  0x57   : > { %800 = vmatpush3.msra.mxu0 %v302_v1  ;;  %871 = vmatpush3.msra.mxu1 %v468_v7  ;;  %v467_v9 = vld [vmem:[#allocation7 + $0x70] sm:$0xff]  ;;  %v466_v10 = vld [vmem:[#allocation7 + $0x68] sm:$0xff]  ;;  %v295_v11 = vld [vmem:[#allocation5 + $0x40] sm:$0xff]  ;;  %s1497_s12 = scalar_lea.hbm %s1548_s5, %s740_s14  ;;  %p1097_p5 = scmp.ne.s32.totalorder %s1499_s10, %s1096_s22 }
  0x58   : > { %801 = vmatprep.subr.mxu0 %v1171_v0  ;;  %872 = vmatprep.subr.mxu1 %v1171_v0  ;;  %v465_v12 = vld [vmem:[#allocation7 + $0x60] sm:$0xff]  ;;  %v294_v13 = vld [vmem:[#allocation5 + $0x38] sm:$0xff]  ;;  %v293_v15 = vld [vmem:[#allocation5 + $0x30] sm:$0xff]  ;;  %p1565_p11 = scmp.ne.s32.totalorder %s1558_s23, 0  ;;  %s1173_s8 = smov [#allocation8]  }
  0x59   : > { %802 = vmatpush3.msra.mxu0 %v301_v2  ;;  %873 = vmatpush3.msra.mxu1 %v467_v9  ;;  %v464_v14 = vld [vmem:[#allocation7 + $0x58] sm:$0xff]  ;;  %v463_v16 = vld [vmem:[#allocation7 + $0x50] sm:$0xff]  ;;  %v292_v17 = vld [vmem:[#allocation5 + $0x28] sm:$0xff]  ;;  %s1100_s7 = sshll.u32 %s1173_s8, 4  ;;  %s1101_s7 = int_to_ptr.vmem [resolvable:$false] %s1100_s7 }
  0x5a   : > { %803 = vmatprep.subr.mxu0 %v1171_v0  ;;  %874 = vmatprep.subr.mxu1 %v1171_v0  ;;  %v462_v18 = vld [vmem:[#allocation7 + $0x48] sm:$0xff]  ;;  %v291_v19 = vld [vmem:[#allocation5 + $0x20] sm:$0xff]  ;;  %v290_v21 = vld [vmem:[#allocation5 + $0x18] sm:$0xff]  ;;  %p1098_p7 = pnand %p1097_p5, %p1565_p11  ;;  %s1102_s30 = scalar_lea.vmem %s1101_s7, 3328 }
  0x5b   : > { %804 = vmatpush3.msra.mxu0 %v300_v3  ;;  %875 = vmatpush3.msra.mxu1 %v466_v10  ;;  %v461_v20 = vld [vmem:[#allocation7 + $0x40] sm:$0xff]  ;;  %v460_v22 = vld [vmem:[#allocation7 + $0x38] sm:$0xff]  ;;  %v289_v23 = vld [vmem:[#allocation5 + $0x10] sm:$0xff]  ;;  %p1103_p13 = scmp.lt.s32.totalorder %s1499_s10, %s1101_s7  ;;  %p1104_p0 = scmp.lt.s32.totalorder %s1102_s30, %s1096_s22 }
  0x5c   : > { %805 = vmatprep.subr.mxu0 %v1171_v0  ;;  %876 = vmatprep.subr.mxu1 %v1171_v0  ;;  %v459_v24 = vld [vmem:[#allocation7 + $0x30] sm:$0xff]  ;;  %v288_v25 = vld [vmem:[#allocation5 + $0x8] sm:$0xff]  ;;  %v287_v27 = vld [vmem:[#allocation5] sm:$0xff]  ;;  %p1099_p12 = pneg %p1098_p7 }
  0x5d   : > { %806 = vmatpush3.msra.mxu0 %v299_v4  ;;  %877 = vmatpush3.msra.mxu1 %v465_v12  ;;  %v458_v26 = vld [vmem:[#allocation7 + $0x28] sm:$0xff]  ;;  %v274_v28 = vld [vmem:[%s1348_s6] sm:$0xff]  ;;  %v457_v29 = vld [vmem:[#allocation7 + $0x20] sm:$0xff]  ;;  %p1105_p10 = por %p1104_p0, %p1103_p13 }
  0x5e   : > { %807 = vmatprep.subr.mxu0 %v1171_v0  ;;  %878 = vmatprep.subr.mxu1 %v1171_v0  ;;  %v456_v30 = vld [vmem:[#allocation7 + $0x18] sm:$0xff]  ;;  %v276_v32 = vld [vmem:[%s1348_s6 + $0x10] sm:$0xff]  ;;  %v277_v33 = vld [vmem:[%s1348_s6 + $0x18] sm:$0xff] }
  0x5f   : > { %808 = vmatpush3.msra.mxu0 %v298_v5  ;;  %879 = vmatpush3.msra.mxu1 %v464_v14  ;;  %v275_v31 = vld [vmem:[%s1348_s6 + $0x8] sm:$0xff]  ;;  %v278_v34 = vld [vmem:[%s1348_s6 + $0x20] sm:$0xff]  ;;  %v280_v36 = vld [vmem:[%s1348_s6 + $0x30] sm:$0xff]  ;;  %p1106_p3 = pnand %p1105_p10, %p1099_p12 }
  0x60   : > { %809 = vmatprep.subr.mxu0 %v1171_v0  ;;  %880 = vmatprep.subr.mxu1 %v1171_v0  ;;  %v279_v35 = vld [vmem:[%s1348_s6 + $0x28] sm:$0xff]  ;;  %v281_v37 = vld [vmem:[%s1348_s6 + $0x38] sm:$0xff]  ;;  %v282_v38 = vld [vmem:[%s1348_s6 + $0x40] sm:$0xff] }
  0x61   : > { %810 = vmatpush3.msra.mxu0 %v297_v6  ;;  %881 = vmatpush3.msra.mxu1 %v463_v16  ;;  %v283_v39 = vld [vmem:[%s1348_s6 + $0x48] sm:$0xff]  ;;  %v284_v40 = vld [vmem:[%s1348_s6 + $0x50] sm:$0xff]  ;;  %v285_v41 = vld [vmem:[%s1348_s6 + $0x58] sm:$0xff] }
  0x62   : > { %811 = vmatprep.subr.mxu0 %v1171_v0  ;;  %882 = vmatprep.subr.mxu1 %v1171_v0  ;;  %v286_v42 = vld [vmem:[%s1348_s6 + $0x60] sm:$0xff]  ;;  %v454_v44 = vld [vmem:[#allocation7 + $0x8] sm:$0xff]  ;;  %v453_v45 = vld [vmem:[#allocation7] sm:$0xff] }
  0x63   : > { %812 = vmatpush3.msra.mxu0 %v296_v8  ;;  %883 = vmatpush3.msra.mxu1 %v462_v18  ;;  %v455_v43 = vld [vmem:[#allocation7 + $0x10] sm:$0xff] }
  0x64   : > { %813 = vmatprep.subr.mxu0 %v1171_v0  ;;  %884 = vmatprep.subr.mxu1 %v1171_v0  ;;  %v1434_v46 = vld [vmem:[%s1545_s2] ss:$0 sm:$0xff] }
  0x65   : > { %814 = vmatpush3.msra.mxu0 %v295_v11  ;;  %885 = vmatpush3.msra.mxu1 %v461_v20 }
  0x66   : > { %815 = vmatprep.subr.mxu0 %v1171_v0  ;;  %886 = vmatprep.subr.mxu1 %v1171_v0 }
  0x67   : > { %816 = vmatpush3.msra.mxu0 %v294_v13  ;;  %887 = vmatpush3.msra.mxu1 %v460_v22 }
  0x68   : > { %817 = vmatprep.subr.mxu0 %v1171_v0  ;;  %888 = vmatprep.subr.mxu1 %v1171_v0 }
  0x69   : > { %818 = vmatpush3.msra.mxu0 %v293_v15  ;;  %889 = vmatpush3.msra.mxu1 %v459_v24 }
  0x6a   : > { %819 = vmatprep.subr.mxu0 %v1171_v0  ;;  %890 = vmatprep.subr.mxu1 %v1171_v0 }
  0x6b   : > { %820 = vmatpush3.msra.mxu0 %v292_v17  ;;  %891 = vmatpush3.msra.mxu1 %v458_v26 }
  0x6c   : > { %821 = vmatprep.subr.mxu0 %v1171_v0  ;;  %892 = vmatprep.subr.mxu1 %v1171_v0 }
  0x6d   : > { %822 = vmatpush3.msra.mxu0 %v291_v19  ;;  %893 = vmatpush3.msra.mxu1 %v457_v29 }
  0x6e   : > { %823 = vmatprep.subr.mxu0 %v1171_v0  ;;  %894 = vmatprep.subr.mxu1 %v1171_v0 }
  0x6f   : > { %824 = vmatpush3.msra.mxu0 %v290_v21  ;;  %895 = vmatpush3.msra.mxu1 %v456_v30 }
  0x70   : > { %825 = vmatprep.subr.mxu0 %v1171_v0  ;;  %896 = vmatprep.subr.mxu1 %v1171_v0 }
  0x71   : > { %826 = vmatpush3.msra.mxu0 %v289_v23  ;;  %897 = vmatpush3.msra.mxu1 %v455_v43 }
  0x72   : > { %827 = vmatprep.subr.mxu0 %v1171_v0  ;;  %898 = vmatprep.subr.mxu1 %v1171_v0 }
  0x73   : > { %828 = vmatpush3.msra.mxu0 %v288_v25  ;;  %899 = vmatpush3.msra.mxu1 %v454_v44 }
  0x74   : > { %829 = vmatprep.subr.mxu0 %v1171_v0  ;;  %900 = vmatprep.subr.mxu1 %v1171_v0 }
  0x75   : > { %830 = vmatpush3.msra.mxu0 %v287_v27  ;;  %901 = vmatpush3.msra.mxu1 %v453_v45 }
  0x76   : > { %832 = vmatmul.mubr.f32.vlgmr.msra.gmra.mxu0 %v274_v28 }
  0x77   : > { %834 = vmatprep.mubr.msk.f32.mxu0 %vm1172_vm0, %v1171_v0 }
  0x7a   : > { %835 = vmatmul.mubr.f32.gmra.mxu0 %v275_v31 }
  0x7b   : > { %837 = vmatprep.mubr.msk.f32.mxu0 %vm1172_vm0, %v1171_v0 }
  0x7e   : > { %838 = vmatmul.mubr.f32.gmra.mxu0 %v276_v32 }
  0x7f   : > { %840 = vmatprep.mubr.msk.f32.mxu0 %vm1172_vm0, %v1171_v0 }
  0x82   : > { %841 = vmatmul.mubr.f32.gmra.mxu0 %v277_v33 }
  0x83   : > { %843 = vmatprep.mubr.msk.f32.mxu0 %vm1172_vm0, %v1171_v0 }
  0x86   : > { %844 = vmatmul.mubr.f32.gmra.mxu0 %v278_v34 }
  0x87   : > { %846 = vmatprep.mubr.msk.f32.mxu0 %vm1172_vm0, %v1171_v0 }
  0x8a   : > { %847 = vmatmul.mubr.f32.gmra.mxu0 %v279_v35 }
  0x8b   : > { %849 = vmatprep.mubr.msk.f32.mxu0 %vm1172_vm0, %v1171_v0 }
  0x8e   : > { %850 = vmatmul.mubr.f32.gmra.mxu0 %v280_v36  ;;  %v735_v36 = vld [vmem:[%s1547_s4] ss:$0 sm:$0xff] }
  0x8f   : > { %852 = vmatprep.mubr.msk.f32.mxu0 %vm1172_vm0, %v1171_v0 }
  0x92   : > { %853 = vmatmul.mubr.f32.gmra.mxu0 %v281_v37 }
  0x93   : > { %855 = vmatprep.mubr.msk.f32.mxu0 %vm1172_vm0, %v1171_v0 }
  0x96   : > { %856 = vmatmul.mubr.f32.gmra.mxu0 %v282_v38 }
  0x97   : > { %858 = vmatprep.mubr.msk.f32.mxu0 %vm1172_vm0, %v1171_v0 }
  0x9a   : > { %859 = vmatmul.mubr.f32.gmra.mxu0 %v283_v39 }
  0x9b   : > { %861 = vmatprep.mubr.msk.f32.mxu0 %vm1172_vm0, %v1171_v0 }
  0x9e   : > { %862 = vmatmul.mubr.f32.gmra.mxu0 %v284_v40 }
  0x9f   : > { %864 = vmatprep.mubr.msk.f32.mxu0 %vm1172_vm0, %v1171_v0 }
  0xa2   : > { %865 = vmatmul.mubr.f32.gmra.mxu0 %v285_v41 }
  0xa3   : > { %867 = vmatprep.mubr.msk.f32.mxu0 %vm1172_vm0, %v1171_v0 }
  0xa6   : > { %868 = vmatmul.mubr.f32.gmra.mxu0 %v286_v42 }
 0x136   : > { %v376_v47 = vpop.f32.mrf.mxu0 }
 0x137   : > { %v377_v48 = vadd.f32 %v1434_v46, %v376_v47 }
 0x138   : > { %v833_v49 = vpop.f32.mrf.mxu0 }
 0x139   : > { %v440_v50 = vmax.f32 %v377_v48, 0.0 }
 0x13a   : > { %v381_v51 = vpop.f32.mrf.mxu0 }
 0x13b   : > { %v382_v52 = vadd.f32 %v1434_v46, %v381_v51  ;;  %903 = vmatmul.mubr.f32.vlgmr.msra.gmra.mxu1 %v440_v50 }
 0x13c   : > { %v836_v53 = vpop.f32.mrf.mxu0  ;;  %905 = vmatprep.mubr.msk.f32.mxu1 %vm1172_vm0, %v1171_v0 }
 0x13d   : > { %v441_v54 = vmax.f32 %v382_v52, 0.0 }
 0x13e   : > { %v386_v55 = vpop.f32.mrf.mxu0 }
 0x13f   : > { %v387_v56 = vadd.f32 %v1434_v46, %v386_v55  ;;  %906 = vmatmul.mubr.f32.gmra.mxu1 %v441_v54 }
 0x140   : > { %v839_v57 = vpop.f32.mrf.mxu0  ;;  %908 = vmatprep.mubr.msk.f32.mxu1 %vm1172_vm0, %v1171_v0 }
 0x141   : > { %v442_v58 = vmax.f32 %v387_v56, 0.0 }
 0x142   : > { %v391_v59 = vpop.f32.mrf.mxu0 }
 0x143   : > { %v392_v60 = vadd.f32 %v1434_v46, %v391_v59  ;;  %909 = vmatmul.mubr.f32.gmra.mxu1 %v442_v58 }
 0x144   : > { %v842_v61 = vpop.f32.mrf.mxu0  ;;  %911 = vmatprep.mubr.msk.f32.mxu1 %vm1172_vm0, %v1171_v0 }
 0x145   : > { %v443_v62 = vmax.f32 %v392_v60, 0.0 }
 0x146   : > { %v396_v63 = vpop.f32.mrf.mxu0 }
 0x147   : > { %v397_v1 = vadd.f32 %v1434_v46, %v396_v63  ;;  %912 = vmatmul.mubr.f32.gmra.mxu1 %v443_v62 }
 0x148   : > { %v845_v2 = vpop.f32.mrf.mxu0  ;;  %914 = vmatprep.mubr.msk.f32.mxu1 %vm1172_vm0, %v1171_v0 }
 0x149   : > { %v444_v3 = vmax.f32 %v397_v1, 0.0 }
 0x14a   : > { %v401_v4 = vpop.f32.mrf.mxu0 }
 0x14b   : > { %v402_v5 = vadd.f32 %v1434_v46, %v401_v4  ;;  %915 = vmatmul.mubr.f32.gmra.mxu1 %v444_v3 }
 0x14c   : > { %v848_v6 = vpop.f32.mrf.mxu0  ;;  %917 = vmatprep.mubr.msk.f32.mxu1 %vm1172_vm0, %v1171_v0 }
 0x14d   : > { %v445_v7 = vmax.f32 %v402_v5, 0.0 }
 0x14e   : > { %v406_v8 = vpop.f32.mrf.mxu0 }
 0x14f   : > { %v407_v9 = vadd.f32 %v1434_v46, %v406_v8  ;;  %918 = vmatmul.mubr.f32.gmra.mxu1 %v445_v7 }
 0x150   : > { %v851_v10 = vpop.f32.mrf.mxu0  ;;  %920 = vmatprep.mubr.msk.f32.mxu1 %vm1172_vm0, %v1171_v0 }
 0x151   : > { %v446_v11 = vmax.f32 %v407_v9, 0.0 }
 0x152   : > { %v411_v12 = vpop.f32.mrf.mxu0 }
 0x153   : > { %v412_v13 = vadd.f32 %v1434_v46, %v411_v12  ;;  %921 = vmatmul.mubr.f32.gmra.mxu1 %v446_v11 }
 0x154   : > { %v854_v14 = vpop.f32.mrf.mxu0  ;;  %923 = vmatprep.mubr.msk.f32.mxu1 %vm1172_vm0, %v1171_v0 }
 0x155   : > { %v447_v15 = vmax.f32 %v412_v13, 0.0 }
 0x156   : > { %v416_v16 = vpop.f32.mrf.mxu0 }
 0x157   : > { %v417_v17 = vadd.f32 %v1434_v46, %v416_v16  ;;  %924 = vmatmul.mubr.f32.gmra.mxu1 %v447_v15 }
 0x158   : > { %v857_v18 = vpop.f32.mrf.mxu0  ;;  %926 = vmatprep.mubr.msk.f32.mxu1 %vm1172_vm0, %v1171_v0 }
 0x159   : > { %v448_v19 = vmax.f32 %v417_v17, 0.0 }
 0x15a   : > { %v421_v20 = vpop.f32.mrf.mxu0 }
 0x15b   : > { %v422_v21 = vadd.f32 %v1434_v46, %v421_v20  ;;  %927 = vmatmul.mubr.f32.gmra.mxu1 %v448_v19 }
 0x15c   : > { %v860_v22 = vpop.f32.mrf.mxu0  ;;  %929 = vmatprep.mubr.msk.f32.mxu1 %vm1172_vm0, %v1171_v0 }
 0x15d   : > { %v449_v23 = vmax.f32 %v422_v21, 0.0 }
 0x15e   : > { %v426_v24 = vpop.f32.mrf.mxu0 }
 0x15f   : > { %v427_v25 = vadd.f32 %v1434_v46, %v426_v24  ;;  %930 = vmatmul.mubr.f32.gmra.mxu1 %v449_v23 }
 0x160   : > { %v863_v26 = vpop.f32.mrf.mxu0  ;;  %932 = vmatprep.mubr.msk.f32.mxu1 %vm1172_vm0, %v1171_v0 }
 0x161   : > { %v450_v27 = vmax.f32 %v427_v25, 0.0 }
 0x162   : > { %v431_v28 = vpop.f32.mrf.mxu0 }
 0x163   : > { %v432_v29 = vadd.f32 %v1434_v46, %v431_v28  ;;  %933 = vmatmul.mubr.f32.gmra.mxu1 %v450_v27 }
 0x164   : > { %v866_v30 = vpop.f32.mrf.mxu0  ;;  %935 = vmatprep.mubr.msk.f32.mxu1 %vm1172_vm0, %v1171_v0 }
 0x165   : > { %v451_v31 = vmax.f32 %v432_v29, 0.0 }
 0x166   : > { %v436_v32 = vpop.f32.mrf.mxu0 }
 0x167   : > { %v437_v33 = vadd.f32 %v1434_v46, %v436_v32  ;;  %936 = vmatmul.mubr.f32.gmra.mxu1 %v451_v31 }
 0x168   : > { %v869_v34 = vpop.f32.mrf.mxu0  ;;  %938 = vmatprep.mubr.msk.f32.mxu1 %vm1172_vm0, %v1171_v0 }
 0x169   : > { %v452_v35 = vmax.f32 %v437_v33, 0.0 }
 0x16b   : > { %939 = vmatmul.mubr.f32.gmra.mxu1 %v452_v35 }
 0x1fb   : > { %v542_v37 = vpop.f32.mrf.mxu1 }
 0x1fc   : > { %v543_v38 = vadd.f32 %v735_v36, %v542_v37 }
 0x1fd   : > { %v904_v39 = vpop.f32.mrf.mxu1 }
 0x1fe   : > { %606 = vst [vmem:[%s1478_s13] sm:$0xff] %v543_v38 }
 0x1ff   : > { %v547_v40 = vpop.f32.mrf.mxu1 }
 0x200   : > { %v548_v0 = vadd.f32 %v735_v36, %v547_v40 }
 0x201   : > { %v907_v41 = vpop.f32.mrf.mxu1 }
 0x202   : > { %607 = vst [vmem:[%s1478_s13 + $0x8] sm:$0xff] %v548_v0 }
 0x203   : > { %v552_v42 = vpop.f32.mrf.mxu1 }
 0x204   : > { %v553_v43 = vadd.f32 %v735_v36, %v552_v42 }
 0x205   : > { %v910_v44 = vpop.f32.mrf.mxu1 }
 0x206   : > { %608 = vst [vmem:[%s1478_s13 + $0x10] sm:$0xff] %v553_v43 }
 0x207   : > { %v557_v45 = vpop.f32.mrf.mxu1 }
 0x208   : > { %v558_v46 = vadd.f32 %v735_v36, %v557_v45 }
 0x209   : > { %v913_v47 = vpop.f32.mrf.mxu1 }
 0x20a   : > { %609 = vst [vmem:[%s1478_s13 + $0x18] sm:$0xff] %v558_v46 }
 0x20b   : > { %v562_v48 = vpop.f32.mrf.mxu1 }
 0x20c   : > { %v563_v49 = vadd.f32 %v735_v36, %v562_v48 }
 0x20d   : > { %v916_v50 = vpop.f32.mrf.mxu1 }
 0x20e   : > { %610 = vst [vmem:[%s1478_s13 + $0x20] sm:$0xff] %v563_v49 }
 0x20f   : > { %v567_v51 = vpop.f32.mrf.mxu1 }
 0x210   : > { %v568_v52 = vadd.f32 %v735_v36, %v567_v51 }
 0x211   : > { %v919_v53 = vpop.f32.mrf.mxu1 }
 0x212   : > { %611 = vst [vmem:[%s1478_s13 + $0x28] sm:$0xff] %v568_v52 }
 0x213   : > { %v572_v54 = vpop.f32.mrf.mxu1 }
 0x214   : > { %v573_v55 = vadd.f32 %v735_v36, %v572_v54 }
 0x215   : > { %v922_v56 = vpop.f32.mrf.mxu1 }
 0x216   : > { %612 = vst [vmem:[%s1478_s13 + $0x30] sm:$0xff] %v573_v55 }
 0x217   : > { %v577_v57 = vpop.f32.mrf.mxu1 }
 0x218   : > { %v578_v58 = vadd.f32 %v735_v36, %v577_v57 }
 0x219   : > { %v925_v59 = vpop.f32.mrf.mxu1 }
 0x21a   : > { %613 = vst [vmem:[%s1478_s13 + $0x38] sm:$0xff] %v578_v58 }
 0x21b   : > { %v582_v60 = vpop.f32.mrf.mxu1 }
 0x21c   : > { %v583_v61 = vadd.f32 %v735_v36, %v582_v60 }
 0x21d   : > { %v928_v62 = vpop.f32.mrf.mxu1 }
 0x21e   : > { %614 = vst [vmem:[%s1478_s13 + $0x40] sm:$0xff] %v583_v61 }
 0x21f   : > { %v587_v63 = vpop.f32.mrf.mxu1 }
 0x220   : > { %v588_v1 = vadd.f32 %v735_v36, %v587_v63 }
 0x221   : > { %v931_v2 = vpop.f32.mrf.mxu1 }
 0x222   : > { %615 = vst [vmem:[%s1478_s13 + $0x48] sm:$0xff] %v588_v1 }
 0x223   : > { %v592_v3 = vpop.f32.mrf.mxu1 }
 0x224   : > { %v593_v4 = vadd.f32 %v735_v36, %v592_v3 }
 0x225   : > { %v934_v5 = vpop.f32.mrf.mxu1 }
 0x226   : > { %616 = vst [vmem:[%s1478_s13 + $0x50] sm:$0xff] %v593_v4 }
 0x227   : > { %v597_v6 = vpop.f32.mrf.mxu1 }
 0x228   : > { %v598_v7 = vadd.f32 %v735_v36, %v597_v6 }
 0x229   : > { %v937_v8 = vpop.f32.mrf.mxu1 }
 0x22a   : > { %617 = vst [vmem:[%s1478_s13 + $0x58] sm:$0xff] %v598_v7 }
 0x22b   : > { %v602_v9 = vpop.f32.mrf.mxu1 }
 0x22c   : > { %v603_v10 = vadd.f32 %v735_v36, %v602_v9 }
 0x22d   : > { %v940_v11 = vpop.f32.mrf.mxu1 }
 0x22e   : > { %618 = vst [vmem:[%s1478_s13 + $0x60] sm:$0xff] %v603_v10 }
 0x22f   : > { %1109 = shalt.err (!%p1106_p3)
}
 0x230   : > { %s1110_s6 = scalar_lea.hbm %s1497_s12, 1664  ;;  %s1114_s9 = scalar_lea.hbm %s1548_s5, 3328 }
 0x231   : > { %p1111_p2 = scmp.ne.s32.totalorder %s1497_s12, %s1110_s6  ;;  %p1115_p4 = scmp.lt.s32.totalorder %s1497_s12, %s1548_s5 }
 0x232   : > { %p1116_p6 = scmp.lt.s32.totalorder %s1114_s9, %s1110_s6 }
 0x233   : > { %p1112_p9 = pnand %p1111_p2, %p1565_p11 }
 0x234   : > { %p1117_p8 = por %p1116_p6, %p1115_p4 }
 0x235   : > { %p1113_p1 = pneg %p1112_p9 }
 0x237   : > { %p1118_p5 = pnand %p1117_p8, %p1113_p1 }
 0x239   : > { %1121 = shalt.err (!%p1118_p5)
}
 0x23a   : > { %s1174_s14 = smov 128   ;;  %s1175_s28 = smov 8  }
 0x23b   : > { %953 = dma.vmem_to_hbm [thread:$0]  (%p1565_p11), %s1499_s10, 1664, %s1497_s12, %s620_s17, %s1174_s14, %s1174_s14, %s1175_s28  }
 0x23c PF: > { %s648_s29 = sand.u32 1, %s1152_s18   ;;  %p1566_p7 = scmp.ne.s32.totalorder %s1555_s25, 0 }
 0x23d   : > { %p1567_p12 = scmp.ge.s32.totalorder %s1164_s21, 2  ;;  %s649_s22 = scalar_lea.sflag [#allocation4], %s648_s29 }
 0x23f   : > { %p967_p13 = pnand %p1567_p12, %p1566_p7 }
 0x241   : > { %p968_p0 = pneg %p967_p13 }
 0x243   : > { %1147 = dma.done.wait (%p968_p0), %s649_s22, 1664  }
 0x244   : > { %1149 = vsyncadd (%p968_p0), %s649_s22, 4294965632  ;;  %p19_p10 = scmp.ge.s32.totalorder %s1284_s15, 4   ;;  %s1568_s18 = smov %s1156_s19 }
 0x245   : > { %s1569_s19 = smov %s1160_s20  ;;  %s1570_s20 = smov %s1300_s27 }
 0x246   : > { %s1571_s21 = smov %s1284_s15  ;;  %21 = sbr.rel (!%p19_p10) target bundleno = 6 (0x6), region = 93 }
 0x24b   :  { %654 = vsyncpa [#allocation3], 1 }
 0x24c   :  { %656 = vsyncpa [#allocation3 + $0x1], 1 }
 0x24d   :  { %657 = vsyncpa [#allocation6], 1 }
 0x24e   :  { %658 = vsyncpa [#allocation4], 1 }
 0x24f   :  { %660 = vsyncpa [#allocation4 + $0x1], 1 }

</bundles_post_ra>
